<compile_context>
chip_gen: v7x
topology: tpu7x:2x2x1
jax: 0.10.0
libtpu: 0.0.40
codegen_flags: <defaults>
</compile_context>

<pallas_src>
import functools

import jax
import jax.numpy as jnp
from jax.experimental import pallas as pl
from jax.experimental.pallas import tpu as pltpu


def _cdiv(a, b):
    return -(-a // b)


# Aim for ~4 MiB input tiles (amortizes per-grid-step overhead).
_TARGET_TILE_BYTES = 4 * 1024 * 1024
# 2x in + 2x out double buffers + up to 2 tile-sized transpose temporaries.
_BUFFER_FACTOR = 6
# Fallbacks if hardware introspection fails: v7x-conservative VMEM, assume
# 2 TensorCores (costs at most one extra grid step on single-TC chips).
_FALLBACK_VMEM_BYTES = 64 * 1024 * 1024
_FALLBACK_NUM_TC = 2

# Chips with a single TensorCore per chip (no megacore sharding available).
_SINGLE_TC_KINDS = ("v5e", "v5 lite", "v5lite", "v6e", "v6 lite", "v6lite")


def _tpu_vmem_and_cores():
    """(physical VMEM bytes per core, TensorCores per chip); conservative on failure."""
    vmem_bytes = _FALLBACK_VMEM_BYTES
    try:
        vmem_bytes = int(pltpu.get_tpu_info().vmem_capacity_bytes)
    except Exception:
        pass
    n_tc = _FALLBACK_NUM_TC
    try:
        kind = jax.devices()[0].device_kind.lower()
        if any(tag in kind for tag in _SINGLE_TC_KINDS):
            n_tc = 1
    except Exception:
        pass
    return vmem_bytes, n_tc


def _choose_tiles(B, C, W, itemsize, vmem_cap, n_tc):
    """Pick (TB, TW): batch-tile and width-tile sizes."""
    budget = vmem_cap // 2  # ~64 MiB on v5e/v6e, ~32 MiB on v7x
    per_batch = C * W * itemsize

    # Dtype-aware floor: keep strided input DMA runs >= ~1 KiB.
    min_tw = max(128, _cdiv(1024 // itemsize, 128) * 128)

    # Tile W only if even a single-batch tile would blow the budget; W tiles
    # must be multiples of 128 (lane dim of the input block / sublane dim of
    # the output block).
    tw = W
    if _BUFFER_FACTOR * per_batch > budget and W >= 2 * min_tw:
        tw = (budget // (_BUFFER_FACTOR * C * itemsize)) // 128 * 128
        tw = min(tw, (W // 128) * 128)
        # For enormous C this floor can overshoot the budget; vmem_limit_bytes
        # below is derived from the actual tile, so the kernel still compiles.
        tw = max(min_tw, tw)
    per_step = C * tw * itemsize

    tb_want = _cdiv(_TARGET_TILE_BYTES, per_step)          # big enough tile
    tb_vmem = max(1, budget // (_BUFFER_FACTOR * per_step))  # fits in budget
    tb = max(1, min(tb_want, tb_vmem, B))

    if n_tc >= 2:
        if B >= 2:
            # Keep >= 2 batch-grid steps so both TensorCores get work.
            tb = min(tb, _cdiv(B, 2))
        elif tw == W and W > 128:
            # B == 1: split W instead so both TensorCores still get work.
            # (ceil(ceil(W/2)/128)*128 is always < W for W > 128.)
            tw = max(128, _cdiv(_cdiv(W, 2), 128) * 128)

    return tb, tw


def _vmem_limit_bytes(tb, C, tw, itemsize, vmem_cap):
    """Scoped VMEM limit derived from the actual tile, with scratch headroom."""
    tile_bytes = tb * C * tw * itemsize
    want = _BUFFER_FACTOR * tile_bytes + 8 * 1024 * 1024
    return int(min(0.9 * vmem_cap, max(32 * 1024 * 1024, want)))


def _im2seq_kernel(x_ref, o_ref):
    # x_ref: (TB, C, TW) block in VMEM ; o_ref: (TB, TW, C) block in VMEM.
    o_ref[...] = jnp.swapaxes(x_ref[...], 1, 2)


@functools.partial(jax.jit, static_argnames=("block_b", "block_w"))
def im2seq(x, block_b=None, block_w=None):
    """x: (B, C, H, W) with H == 1  ->  (B, W, C)."""
    B, C, H, W = x.shape
    if H != 1:
        raise ValueError("Im2Seq requires H == 1")
    x_ncw = x.reshape(B, C, W)  # squeeze H (pure layout glue)

    itemsize = x.dtype.itemsize
    vmem_cap, n_tc = _tpu_vmem_and_cores()
    tb_auto, tw_auto = _choose_tiles(B, C, W, itemsize, vmem_cap, n_tc)
    tb = block_b if block_b is not None else tb_auto
    tw = block_w if block_w is not None else tw_auto
    vmem_limit = _vmem_limit_bytes(tb, C, tw, itemsize, vmem_cap)

    grid = (pl.cdiv(B, tb), pl.cdiv(W, tw))
    out = pl.pallas_call(
        _im2seq_kernel,
        out_shape=jax.ShapeDtypeStruct((B, W, C), x.dtype),
        grid_spec=pltpu.PrefetchScalarGridSpec(
            num_scalar_prefetch=0,
            grid=grid,
            in_specs=[pl.BlockSpec((tb, C, tw), lambda b, w: (b, 0, w))],
            out_specs=pl.BlockSpec((tb, tw, C), lambda b, w: (b, w, 0)),
        ),
        compiler_params=pltpu.CompilerParams(
            dimension_semantics=("parallel", "parallel"),
            vmem_limit_bytes=vmem_limit,
        ),
        cost_estimate=pl.CostEstimate(
            flops=0,
            transcendentals=0,
            bytes_accessed=2 * B * C * W * itemsize,
        ),
    )(x_ncw)
    return out


def _reference(x):
    # squeeze H (==1), then permute (0, 2, 1)
    return jnp.transpose(x[:, :, 0, :], (0, 2, 1))


if __name__ == "__main__":
    key = jax.random.PRNGKey(0)
    k1, k2, k3, k4 = jax.random.split(key, 4)

    # Check 1: small NCHW shape consistent with the module (H == 1), f32.
    B, C, H, W = 2, 32, 1, 64
    x1 = jax.random.normal(k1, (B, C, H, W), dtype=jnp.float32)
    y1 = jax.block_until_ready(im2seq(x1))
    assert y1.shape == (B, W, C), y1.shape
    assert jnp.array_equal(y1, _reference(x1)), "mismatch vs reference (f32)"

    # Check 2: ragged batch grid (TB does not divide B), non-multiple-of-128 dims.
    B2, C2, W2 = 5, 48, 40
    x2 = jax.random.normal(k2, (B2, C2, 1, W2), dtype=jnp.float32)
    y2 = jax.block_until_ready(im2seq(x2))
    assert y2.shape == (B2, W2, C2), y2.shape
    assert jnp.array_equal(y2, _reference(x2)), "mismatch vs reference (ragged B)"

    # Check 3: bf16 dtype.
    x3 = jax.random.normal(k3, (B, C, H, W), dtype=jnp.bfloat16)
    y3 = jax.block_until_ready(im2seq(x3))
    assert y3.shape == (B, W, C), y3.shape
    assert jnp.array_equal(y3, _reference(x3)), "mismatch vs reference (bf16)"

    # Check 4: B == 1 with W > 128 — exercises the two-TensorCore W-split path
    # (on v7x-class chips) and a ragged W remainder.
    B4, C4, W4 = 1, 64, 320
    x4 = jax.random.normal(k4, (B4, C4, 1, W4), dtype=jnp.float32)
    y4 = jax.block_until_ready(im2seq(x4))
    assert y4.shape == (B4, W4, C4), y4.shape
    assert jnp.array_equal(y4, _reference(x4)), "mismatch vs reference (B=1 W-split)"

    print("KERNEL_OK")
</pallas_src>

<mosaic_0001>
module attributes {stable_mosaic.version = 11 : i64} {
  func.func @_im2seq_kernel(%arg0: i32, %arg1: i32, %arg2: memref<1x32x64xf32, #tpu.memory_space<vmem>>, %arg3: memref<1x64x32xf32, #tpu.memory_space<vmem>>) attributes {dimension_semantics = [#tpu.dimension_semantics<parallel>, #tpu.dimension_semantics<parallel>], iteration_bounds = array<i64: 2, 1>, scalar_prefetch = 0 : i64, scratch_operands = 0 : i64, tpu.core_type = #tpu.core_type<tc>, window_params = [{transform_indices = @transform_0, window_bounds = array<i64: 1, 32, 64>}, {transform_indices = @transform_1, window_bounds = array<i64: 1, 64, 32>}]} {
    %c0 = arith.constant 0 : index
    %c0_0 = arith.constant 0 : index
    %c0_1 = arith.constant 0 : index
    %0 = vector.load %arg2[%c0, %c0_0, %c0_1] : memref<1x32x64xf32, #tpu.memory_space<vmem>>, vector<1x32x64xf32>
    %1 = tpu.transpose %0, [0, 2, 1] : vector<1x32x64xf32> -> vector<1x64x32xf32>
    %c0_2 = arith.constant 0 : index
    %c0_3 = arith.constant 0 : index
    %c0_4 = arith.constant 0 : index
    %2 = vector.load %arg3[%c0_2, %c0_3, %c0_4] : memref<1x64x32xf32, #tpu.memory_space<vmem>>, vector<1x64x32xf32>
    tpu.vector_store %arg3[%c0_2, %c0_3, %c0_4], %1 {strides = array<i32>} : memref<1x64x32xf32, #tpu.memory_space<vmem>>, vector<1x64x32xf32>,
    return
  }
  func.func @transform_0(%arg0: i32, %arg1: i32) -> (i32, i32, i32) {
    %c0_i32 = arith.constant 0 : i32
    %c0_i32_0 = arith.constant 0 : i32
    return %arg0, %c0_i32, %arg1 : i32, i32, i32
  }
  func.func @transform_1(%arg0: i32, %arg1: i32) -> (i32, i32, i32) {
    %c0_i32 = arith.constant 0 : i32
    %c0_i32_0 = arith.constant 0 : i32
    return %arg0, %arg1, %c0_i32 : i32, i32, i32
  }
}

</mosaic_0001>

<bundles_post_ra>
// kernel: im2seq.1
= control target key start
LH: loop header
LB: loop body
LE: loop exit
PB: predicated region body
PF: predicated region fallthrough
CT: control target
= control target key end

     0   :  { %6 = vsyncpa [#allocation3], 0  ;;  %s602_s0 = inlined_call_operand.hbm [shape: f32[2,32,64], index: 0, kind: input, shape index: {}]   ;;  %s603_s1 = inlined_call_operand.vmem [shape: f32[2,64,32], index: 1, kind: output, shape index: {}]  }
   0x1   :  { %8 = vsyncpa [#allocation3 + $0x1], 0  ;;  %s470_s6 = smov 0   ;;  %s472_s7 = smov 0  }
   0x2   :  { %s474_s8 = smov 0   ;;  %s476_s9 = smov 0  }
   0x3   :  { %s478_s10 = smov 0   ;;  %s480_s11 = smov 0  }
   0x4 LB: > { %s302_s12 = sadd.s32 4294967295, %s455_s11   ;;  %s26_s13 = sadd.s32 1, %s451_s10  ;;  %s455_s11 = sphi %s480_s11, %s14_s11   ;;  %s451_s10 = sphi %s478_s10, %s611_s10   ;;  %s447_s9 = sphi %s476_s9, %s610_s9   ;;  %s443_s8 = sphi %s474_s8, %s609_s8   ;;  %s439_s7 = sphi %s472_s7, %s608_s7   ;;  %s435_s6 = sphi %s470_s6, %s607_s6  }
   0x5   : > { %p28_p0 = scmp.ge.s32.totalorder %s26_s13, 2  ;;  %s35_s14 = sadd.s32 1, %s443_s8 }
   0x6   : > { %p42_p1 = scmp.ne.s32.totalorder %s443_s8, %s439_s7  ;;  %p43_p2 = scmp.eq.s32.totalorder %s455_s11, 0 }
   0x7   : > { %s613_s13 = smov (%p28_p0, %s26_s13), 0  ;;  %p48_p4 = scmp.ne.s32.totalorder %s439_s7, %s435_s6 }
   0x8   : > { %p506_p3 = por %p43_p2, %p42_p1  ;;  %s30_s16 = ssub.s32 %s451_s10, %s613_s13 }
   0x9   : > { %p49_p5 = scmp.eq.s32.totalorder %s302_s12, 0  ;;  %p33_p6 = scmp.eq.s32.totalorder %s30_s16, 0 }
   0xa   : > { %p323_p8 = scmp.lt.s32.totalorder %s455_s11, 2  ;;  %s100_s19 = sand.u32 1, %s443_s8  }
   0xb   : > { %p513_p7 = por %p49_p5, %p48_p4  ;;  %s315_s20 = sshll.u32 %s451_s10, 9 }
   0xc   : > { %s519_s18 = scalar_select %p33_p6, %s443_s8, %s35_s14  }
   0xd   : > { %s306_s21 = sshll.u32 %s100_s19, 5  ;;  %s526_s24 = scalar_lea.hbm %s602_s0, %s315_s20 }
   0xe   : > { %s104_s25 = scalar_lea.vmem [#allocation2], %s306_s21  ;;  %p530_p9 = pnand %p323_p8, %p506_p3 }
   0xf   : > { %s112_s26 = sshll.u32 %s104_s25, 4  ;;  %s536_s28 = scalar_lea.sflag [#allocation3], %s100_s19  ;;  %s534_s26 = int_to_ptr.vmem [resolvable:$true] %s112_s26 }
  0x10   : > { %s375_s29 = scalar_lea.hbm %s526_s24, 512  ;;  %p377_p11 = pneg %p530_p9 }
  0x11   : > { %p376_p10 = scmp.ne.s32.totalorder %s526_s24, %s375_s29  ;;  %s380_s3 = scalar_lea.hbm %s602_s0, 1024 }
  0x12   : > { %p381_p0 = scmp.lt.u32.totalorder %s526_s24, %s602_s0  ;;  %p382_p1 = scmp.lt.u32.totalorder %s380_s3, %s375_s29 }
  0x13   : > { %p378_p12 = pnand %p377_p11, %p376_p10  ;;  %p384_p3 = scmp.lt.u32.totalorder %s375_s29, %s526_s24 }
  0x14   : > { %p383_p2 = por %p382_p1, %p381_p0 }
  0x15   : > { %p379_p13 = pneg %p378_p12 }
  0x16   : > { %p385_p4 = por %p384_p3, %p383_p2 }
  0x18   : > { %p386_p5 = pnand %p385_p4, %p379_p13 }
  0x1a   : > { %389 = shalt.err (!%p386_p5)
}
  0x1b   : > { %s390_s6 = scalar_lea.vmem %s534_s26, 512  ;;  %s457_s12 = smov [#allocation2]  }
  0x1c   : > { %p391_p6 = scmp.ne.s32.totalorder %s534_s26, %s390_s6  ;;  %s395_s14 = sshll.u32 %s457_s12, 4  ;;  %s396_s14 = int_to_ptr.vmem [resolvable:$false] %s395_s14 }
  0x1d   : > { %s397_s15 = scalar_lea.vmem %s396_s14, 1024  ;;  %p398_p12 = scmp.lt.s32.totalorder %s534_s26, %s396_s14 }
  0x1e   : > { %p393_p8 = pnand %p391_p6, %p377_p11  ;;  %p399_p0 = scmp.lt.s32.totalorder %s397_s15, %s390_s6 }
  0x20   : > { %p394_p10 = pneg %p393_p8  ;;  %p400_p1 = por %p399_p0, %p398_p12 }
  0x22   : > { %p401_p2 = pnand %p400_p1, %p394_p10 }
  0x24   : > { %404 = shalt.err (!%p401_p2)
}
  0x25   : > { %s458_s16 = smov 128   ;;  %s459_s19 = smov 8  }
  0x26   : > { %322 = dma.hbm_to_vmem [thread:$0]  (!%p530_p9), %s526_s24, 512, %s534_s26, %s536_s28, %s458_s16, %s458_s16, %s459_s19  }
  0x27   : > { %p309_p11 = scmp.ge.s32.totalorder %s455_s11, 1  ;;  %p120_p13 = scmp.lt.s32.totalorder %s455_s11, 3 }
  0x29   : > { %p121_p3 = pnand %p309_p11, %p120_p13 }
  0x2a   : > { %s126_s20 = sand.u32 (!%p121_p3), 1, %s439_s7  }
  0x2b   : > { %124 = sbr.rel (%p121_p3) target bundleno = 210 (0xd2), region = 24  ;;  %s310_s21 = sshll.u32 (!%p121_p3), %s126_s20, 5 }
  0x2c   : > { %s127_s22 = scalar_lea.sflag (!%p121_p3), [#allocation3], %s126_s20  ;;  %s130_s23 = scalar_lea.vmem (!%p121_p3), [#allocation2], %s310_s21 }
  0x32   : > { %430 = dma.done.wait (%p513_p7), %s127_s22, 512  }
  0x33   : > { %432 = vsyncadd (%p513_p7), %s127_s22, 4294966784  ;;  %v163_v0 = vld [vmem:[%s130_s23] sm:$0xff]  ;;  %v164_v1 = vld [vmem:[%s130_s23 + $0x8] sm:$0xff]  ;;  %p154_p9 = scmp.lt.s32.totalorder %s447_s9, 1  ;;  %vm199_vm0 = vcmask 261120  }
  0x34   : > { %167 = vxpose.xlu0.b32.start [1/4] (short) (narrow) %v163_v0, 64  ;;  %v165_v2 = vld [vmem:[%s130_s23 + $0x10] sm:$0xff]  ;;  %v166_v3 = vld [vmem:[%s130_s23 + $0x18] sm:$0xff] }
  0x35   : > { %s615_s9 = smov (!%p154_p9, %s447_s9), 1 }
  0x36   : > { %s316_s24 = sshll.u32 %s615_s9, 6 }
  0x37   : > { %s161_s27 = scalar_lea.vmem %s603_s1, %s316_s24 }
  0x38   : > { %168 = vxpose.xlu0.b32.cont [2/4] (short) (narrow) %v164_v1, 64 }
  0x3c   : > { %169 = vxpose.xlu0.b32.cont [3/4] (short) (narrow) %v165_v2, 64 }
  0x40   : > { %170 = vxpose.xlu0.b32.end [4/4] (short) (narrow) %v166_v3, 64 }
  0xb4   : > { %v183_v4 = vpop.trf.xlu0 }
  0xb5   : > { %200 = vst.msk [vmem:[%s161_s27] sm:$0xff] %vm199_vm0, %v183_v4 }
  0xb8   : > { %v184_v5 = vpop.trf.xlu0 }
  0xb9   : > { %201 = vst.msk [vmem:[%s161_s27 + $0x8] sm:$0xff] %vm199_vm0, %v184_v5 }
  0xbc   : > { %v185_v6 = vpop.trf.xlu0 }
  0xbd   : > { %202 = vst.msk [vmem:[%s161_s27 + $0x10] sm:$0xff] %vm199_vm0, %v185_v6 }
  0xc0   : > { %v186_v7 = vpop.trf.xlu0 }
  0xc1   : > { %203 = vst.msk [vmem:[%s161_s27 + $0x18] sm:$0xff] %vm199_vm0, %v186_v7 }
  0xc4   : > { %v187_v8 = vpop.trf.xlu0 }
  0xc5   : > { %204 = vst.msk [vmem:[%s161_s27 + $0x20] sm:$0xff] %vm199_vm0, %v187_v8 }
  0xc8   : > { %v188_v9 = vpop.trf.xlu0 }
  0xc9   : > { %205 = vst.msk [vmem:[%s161_s27 + $0x28] sm:$0xff] %vm199_vm0, %v188_v9 }
  0xcc   : > { %v189_v10 = vpop.trf.xlu0 }
  0xcd   : > { %206 = vst.msk [vmem:[%s161_s27 + $0x30] sm:$0xff] %vm199_vm0, %v189_v10 }
  0xd0   : > { %v190_v11 = vpop.trf.xlu0 }
  0xd1   : > { %207 = vst.msk [vmem:[%s161_s27 + $0x38] sm:$0xff] %vm199_vm0, %v190_v11 }
  0xd2 PF: > { %s14_s11 = sadd.s32 1, %s455_s11   ;;  %s607_s6 = smov %s439_s7 }
  0xd3   : > { %p11_p7 = scmp.ge.s32.totalorder %s14_s11, 4   ;;  %s608_s7 = smov %s443_s8 }
  0xd4   : > { %s609_s8 = smov %s519_s18  ;;  %s610_s9 = smov %s451_s10 }
  0xd5   : > { %s611_s10 = smov %s613_s13  ;;  %13 = sbr.rel (!%p11_p7) target bundleno = 4 (0x4), region = 64 }
  0xdc   :  { %238 = vsyncpa [#allocation3], 1 }
  0xdd   :  { %240 = vsyncpa [#allocation3 + $0x1], 1 }

</bundles_post_ra>
